<compile_context>
chip_gen: v6e
topology: v6e:2x2x1
jax: 0.10.0
libtpu: 0.0.40
codegen_flags: <defaults>
</compile_context>

<pallas_src>
import jax
import jax.numpy as jnp
from jax.experimental import pallas as pl
from jax.experimental.pallas import tpu as pltpu


def _round_up(x, m):
    return (x + m - 1) // m * m


def _make_kernel(layer_dims, row_offsets, has_exposure):
    """Kernel body for a fixed layer stack.

    layer_dims:  tuple of (d_out, d_in) for every hidden layer followed by the
                 last_hidden_layer (which produces the attention weights).
    row_offsets: static row offsets of each layer inside the packed slab.
    """
    num_layers = len(layer_dims)

    def kernel(scal_ref, x_ref, slab_ref, *rest):
        # scal_ref: (2,) SMEM -> [w_out, b_out] of the Linear(1,1) output layer
        # x_ref:    (D, tm)  feature-major tile, batch on lanes
        # slab_ref: (R, C)   packed weights+biases (constant across the grid)
        # rest:     (exp_ref,) out_ref   or   (out_ref,)
        if has_exposure:
            exp_ref, out_ref = rest
        else:
            (out_ref,) = rest

        xf = x_ref[...].astype(jnp.float32)                       # (D, tm)
        h = xf
        for li in range(num_layers):
            d_out, d_in = layer_dims[li]
            r0 = row_offsets[li]
            w = slab_ref[pl.ds(r0, d_out), pl.ds(0, d_in)]         # (d_out, d_in)
            b = slab_ref[pl.ds(r0, d_out), pl.ds(d_in, 1)]         # (d_out, 1)
            z = jnp.dot(w, h.astype(w.dtype),
                        preferred_element_type=jnp.float32)
            z = z + b.astype(jnp.float32)                          # (d_out, tm)
            # Hidden layers get tanh; the last layer yields the attention
            # weights (no activation).
            h = jnp.tanh(z) if li < num_layers - 1 else z

        attn = h                                                   # (D, tm)
        # skip_connection = per-sample dot(attn, features): sublane reduce.
        skip = jnp.sum(attn * xf, axis=0, keepdims=True)           # (1, tm)

        # output_layer (Linear(1,1)) + exp inverse link (+ exposure)
        w_out = scal_ref[0]
        b_out = scal_ref[1]
        y = jnp.exp(skip * w_out + b_out)                          # (1, tm)
        if has_exposure:
            y = y * exp_ref[...].astype(jnp.float32)
        out_ref[...] = y.astype(out_ref.dtype)

    return kernel


def _pack_weight_slab(hidden, last, dtype):
    """Pack all (W, b) pairs into one VMEM-friendly slab.

    Layer i occupies rows [off_i, off_i + d_out): columns [0, d_in) hold W and
    column d_in holds b.  Row offsets are padded to multiples of 16 so static
    slices stay sublane-tile aligned for both f32 and bf16 slabs.
    """
    mats = list(hidden) + [last]
    width = _round_up(max(w.shape[1] for w, _ in mats) + 1, 128)
    blocks, offsets, dims = [], [], []
    r = 0
    for w, b in mats:
        w = jnp.asarray(w, jnp.float32)
        b = jnp.asarray(b, jnp.float32).reshape(-1)
        d_out, d_in = w.shape
        rows = _round_up(d_out, 16)
        blk = jnp.zeros((rows, width), jnp.float32)
        blk = blk.at[:d_out, :d_in].set(w)
        blk = blk.at[:d_out, d_in].set(b)
        blocks.append(blk)
        offsets.append(r)
        dims.append((d_out, d_in))
        r += rows
    slab = jnp.concatenate(blocks, axis=0).astype(dtype)
    return slab, tuple(offsets), tuple(dims)


def local_glm_net_forward(features, params, exposure=None, *, tm=8192,
                          feature_major=False, stream_dtype=None,
                          weights_dtype=None):
    """Pallas forward pass of LocalGLMNet.

    Args:
      features: (N, D) batch-major, or (D, N) feature-major if
        feature_major=True (preferred: avoids a wrapper-side relayout pass).
      params: dict with
        'hidden':      list of (W (d_out, d_in), b (d_out, 1)) (PyTorch layout)
        'last':        (W (D, h_last), b (D, 1))
        'out_scalars': (2,) [w_out, b_out] of the Linear(1,1) output layer
      exposure: optional (N,) or (N, 1); when None no exposure stream is used.
      tm: batch tile (samples per grid step), rounded to a multiple of 128.
      stream_dtype: optional dtype for the streamed feature slab (e.g.
        jnp.bfloat16 halves HBM traffic); compute stays f32.
      weights_dtype: optional dtype for the packed weight slab / MXU inputs
        (e.g. jnp.bfloat16); accumulation stays f32.
    Returns:
      (N, 1) float32.
    """
    if feature_major:
        D, N = features.shape
        x_t = features
    else:
        # NOTE: this transpose is a full extra HBM read+write of the feature
        # matrix; pass (D, N) data with feature_major=True to avoid it.
        N, D = features.shape
        x_t = features.T

    stream_dtype = jnp.dtype(stream_dtype) if stream_dtype is not None else x_t.dtype
    weights_dtype = jnp.dtype(weights_dtype) if weights_dtype is not None else jnp.float32

    out_scalars = jnp.asarray(params["out_scalars"], jnp.float32).reshape(2)
    slab, row_offsets, layer_dims = _pack_weight_slab(
        params["hidden"], params["last"], weights_dtype)

    # Batch tiling: batch lives on the 128-lane axis.  Big tiles amortize the
    # per-grid-step overhead; cap so the ("parallel",) grid has >= 2 steps
    # when there is enough data (keeps both v7x TensorCores busy).
    n128 = _round_up(max(N, 1), 128)
    tm = _round_up(max(128, min(tm, n128)), 128)
    if n128 >= 256 and tm >= n128:
        tm = _round_up(n128 // 2, 128)
    n_pad = n128
    grid = (pl.cdiv(n_pad, tm),)

    if x_t.dtype != stream_dtype:
        x_t = x_t.astype(stream_dtype)
    if n_pad != N:
        x_t = jnp.pad(x_t, ((0, 0), (0, n_pad - N)))

    has_exposure = exposure is not None

    inputs = [x_t, slab]
    in_specs = [
        # Feature tile: (D, tm), batch on lanes.  D equals the full array dim,
        # so the block is legal for any D and any stream dtype.
        pl.BlockSpec((D, tm), lambda i, s: (0, i)),
        # Whole-array weight slab with a constant block index: DMA'd once and
        # resident in VMEM for the entire grid.
        pl.BlockSpec(slab.shape, lambda i, s: (0, 0)),
    ]
    if has_exposure:
        exp_row = jnp.asarray(exposure, jnp.float32).reshape(1, N)
        if n_pad != N:
            exp_row = jnp.pad(exp_row, ((0, 0), (0, n_pad - N)))
        inputs.append(exp_row)
        in_specs.append(pl.BlockSpec((1, tm), lambda i, s: (0, i)))

    kernel = _make_kernel(layer_dims, row_offsets, has_exposure)

    out_row = pl.pallas_call(
        kernel,
        out_shape=jax.ShapeDtypeStruct((1, n_pad), jnp.float32),
        grid_spec=pltpu.PrefetchScalarGridSpec(
            num_scalar_prefetch=1,            # out_scalars land in SMEM
            grid=grid,
            in_specs=in_specs,
            out_specs=pl.BlockSpec((1, tm), lambda i, s: (0, i)),
        ),
        compiler_params=pltpu.CompilerParams(
            dimension_semantics=("parallel",),
        ),
    )(out_scalars, *inputs)

    return out_row[0, :N].reshape(N, 1)


def init_params(key, input_size, hidden_layer_sizes):
    """Deterministic init mimicking nn.Linear default (uniform +/- 1/sqrt(fan_in)).

    Weights are stored in PyTorch layout (out_dim, in_dim); biases as (out_dim, 1)."""
    params = {"hidden": []}
    sizes = [input_size] + list(hidden_layer_sizes)
    for i in range(len(hidden_layer_sizes)):
        d_in, d_out = sizes[i], sizes[i + 1]
        key, kw, kb = jax.random.split(key, 3)
        bound = 1.0 / jnp.sqrt(d_in)
        w = jax.random.uniform(kw, (d_out, d_in), jnp.float32, -bound, bound)
        b = jax.random.uniform(kb, (d_out, 1), jnp.float32, -bound, bound)
        params["hidden"].append((w, b))

    # last_hidden_layer: hidden[-1] -> input_size
    d_in = hidden_layer_sizes[-1]
    key, kw, kb = jax.random.split(key, 3)
    bound = 1.0 / jnp.sqrt(d_in)
    params["last"] = (
        jax.random.uniform(kw, (input_size, d_in), jnp.float32, -bound, bound),
        jax.random.uniform(kb, (input_size, 1), jnp.float32, -bound, bound),
    )

    # output_layer: Linear(1, 1) -> two scalars [w_out, b_out]
    key, kw, kb = jax.random.split(key, 3)
    params["out_scalars"] = jnp.concatenate([
        jax.random.uniform(kw, (1,), jnp.float32, -1.0, 1.0),
        jax.random.uniform(kb, (1,), jnp.float32, -1.0, 1.0),
    ])
    return params


def reference_forward(features, params, exposure=None, *, stream_dtype=None,
                      weights_dtype=None):
    """Pure-JAX reference matching the PyTorch forward.

    stream_dtype / weights_dtype emulate the kernel's optional low-precision
    casts so the comparison isolates kernel bugs from quantization error."""
    hp = jax.lax.Precision.HIGHEST
    f32 = jnp.float32
    wd = jnp.dtype(weights_dtype) if weights_dtype is not None else f32

    x = jnp.asarray(features, f32)
    if stream_dtype is not None:
        x = x.astype(stream_dtype).astype(f32)

    def lin(h, w, b):
        w = jnp.asarray(w, f32).astype(wd)
        b = jnp.asarray(b, f32).astype(wd).astype(f32).reshape(1, -1)
        return jnp.dot(h.astype(wd), w.T, precision=hp,
                       preferred_element_type=f32) + b

    h = x
    for (w, b) in params["hidden"]:
        h = jnp.tanh(lin(h, w, b))
    w_last, b_last = params["last"]
    attn = lin(h, w_last, b_last)

    skip = jnp.sum(attn * x, axis=1, keepdims=True)
    w_out, b_out = params["out_scalars"][0], params["out_scalars"][1]
    y = jnp.exp(skip * w_out + b_out)
    if exposure is not None:
        y = y * jnp.asarray(exposure, f32).reshape(-1, 1)
    return y


if __name__ == "__main__":
    key = jax.random.PRNGKey(0)
    key, kf, ke, kp = jax.random.split(key, 4)

    input_size = 16
    hidden_layer_sizes = [32, 32]
    batch = 256

    # Feature-major (D, N) slab: the fast path with no wrapper-side relayout.
    features_t = jax.random.normal(kf, (input_size, batch), jnp.float32)
    features = features_t.T                       # (N, D) view for the reference
    exposure = jax.random.uniform(ke, (batch, 1), jnp.float32, 0.5, 1.5)

    params = init_params(kp, input_size, hidden_layer_sizes)

    # 1) f32 path with exposure (tight tolerance vs. pure-JAX reference).
    out = local_glm_net_forward(features_t, params, exposure, feature_major=True)
    out = jax.block_until_ready(out)
    ref = reference_forward(features, params, exposure)
    assert out.shape == (batch, 1)
    assert jnp.allclose(out, ref, rtol=1e-4, atol=1e-4), (
        f"f32 mismatch: max abs err {jnp.max(jnp.abs(out - ref))}")

    # 2) bf16-streamed path (bf16 features + bf16 MXU inputs, f32 accumulate),
    #    no exposure -> exercises the exposure-free kernel variant.  The
    #    reference emulates the same casts, so the tolerance only has to cover
    #    accumulation-order / transcendental differences.
    out_bf16 = local_glm_net_forward(
        features_t, params, None, feature_major=True,
        stream_dtype=jnp.bfloat16, weights_dtype=jnp.bfloat16)
    out_bf16 = jax.block_until_ready(out_bf16)
    ref_bf16 = reference_forward(features, params, None,
                                 stream_dtype=jnp.bfloat16,
                                 weights_dtype=jnp.bfloat16)
    assert out_bf16.shape == (batch, 1)
    assert jnp.allclose(out_bf16, ref_bf16, rtol=1e-2, atol=1e-2), (
        f"bf16 mismatch: max abs err {jnp.max(jnp.abs(out_bf16 - ref_bf16))}")

    print("KERNEL_OK")
</pallas_src>

<mosaic_0001>
module attributes {stable_mosaic.version = 11 : i64} {
  func.func @kernel(%arg0: i32, %arg1: memref<2xf32, #tpu.memory_space<smem>>, %arg2: memref<16x128xf32, #tpu.memory_space<vmem>>, %arg3: memref<80x128xf32, #tpu.memory_space<vmem>>, %arg4: memref<1x128xf32, #tpu.memory_space<vmem>>, %arg5: memref<1x128xf32, #tpu.memory_space<vmem>>) attributes {dimension_semantics = [#tpu.dimension_semantics<parallel>], iteration_bounds = array<i64: 2>, scalar_prefetch = 1 : i64, scratch_operands = 0 : i64, tpu.core_type = #tpu.core_type<tc>, window_params = [{transform_indices = @transform_0, window_bounds = array<i64: 16, 128>}, {pipeline_mode = #tpu.pipeline_mode<synchronous>, transform_indices = @transform_1, window_bounds = array<i64: 80, 128>}, {transform_indices = @transform_2, window_bounds = array<i64: 1, 128>}, {transform_indices = @transform_3, window_bounds = array<i64: 1, 128>}]} {
    %c0 = arith.constant 0 : index
    %c0_0 = arith.constant 0 : index
    %0 = vector.load %arg2[%c0, %c0_0] : memref<16x128xf32, #tpu.memory_space<vmem>>, vector<16x128xf32>
    %c0_1 = arith.constant 0 : index
    %c0_2 = arith.constant 0 : index
    %1 = vector.load %arg3[%c0_1, %c0_2] : memref<80x128xf32, #tpu.memory_space<vmem>>, vector<32x16xf32>
    %c0_3 = arith.constant 0 : index
    %c16 = arith.constant 16 : index
    %2 = vector.load %arg3[%c0_3, %c16] : memref<80x128xf32, #tpu.memory_space<vmem>>, vector<32x1xf32>
    %cst = arith.constant dense<0.000000e+00> : vector<32x128xf32>
    %3 = tpu.matmul %1, %0, %cst {dimension_numbers = #tpu.dot_dimension_numbers<[1], [0], [0], [1], [0, 0, 1, 1], [], []>} : vector<32x16xf32>, vector<16x128xf32>, vector<32x128xf32> -> vector<32x128xf32>
    %4 = vector.broadcast %2 : vector<32x1xf32> to vector<32x128xf32>
    %5 = arith.addf %3, %4 : vector<32x128xf32>
    %6 = math.tanh %5 : vector<32x128xf32>
    %c32 = arith.constant 32 : index
    %c0_4 = arith.constant 0 : index
    %7 = vector.load %arg3[%c32, %c0_4] : memref<80x128xf32, #tpu.memory_space<vmem>>, vector<32x32xf32>
    %c32_5 = arith.constant 32 : index
    %c32_6 = arith.constant 32 : index
    %8 = vector.load %arg3[%c32_5, %c32_6] : memref<80x128xf32, #tpu.memory_space<vmem>>, vector<32x1xf32>
    %cst_7 = arith.constant dense<0.000000e+00> : vector<32x128xf32>
    %9 = tpu.matmul %7, %6, %cst_7 {dimension_numbers = #tpu.dot_dimension_numbers<[1], [0], [0], [1], [0, 0, 1, 1], [], []>} : vector<32x32xf32>, vector<32x128xf32>, vector<32x128xf32> -> vector<32x128xf32>
    %10 = vector.broadcast %8 : vector<32x1xf32> to vector<32x128xf32>
    %11 = arith.addf %9, %10 : vector<32x128xf32>
    %12 = math.tanh %11 : vector<32x128xf32>
    %c64 = arith.constant 64 : index
    %c0_8 = arith.constant 0 : index
    %13 = vector.load %arg3[%c64, %c0_8] : memref<80x128xf32, #tpu.memory_space<vmem>>, vector<16x32xf32>
    %c64_9 = arith.constant 64 : index
    %c32_10 = arith.constant 32 : index
    %14 = vector.load %arg3[%c64_9, %c32_10] : memref<80x128xf32, #tpu.memory_space<vmem>>, vector<16x1xf32>
    %cst_11 = arith.constant dense<0.000000e+00> : vector<16x128xf32>
    %15 = tpu.matmul %13, %12, %cst_11 {dimension_numbers = #tpu.dot_dimension_numbers<[1], [0], [0], [1], [0, 0, 1, 1], [], []>} : vector<16x32xf32>, vector<32x128xf32>, vector<16x128xf32> -> vector<16x128xf32>
    %16 = vector.broadcast %14 : vector<16x1xf32> to vector<16x128xf32>
    %17 = arith.addf %15, %16 : vector<16x128xf32>
    %18 = arith.mulf %17, %0 : vector<16x128xf32>
    %cst_12 = arith.constant dense<0.000000e+00> : vector<128xf32>
    %19 = vector.multi_reduction <add>, %18, %cst_12 [0] : vector<16x128xf32> to vector<128xf32>
    %20 = vector.shape_cast %19 : vector<128xf32> to vector<1x128xf32>
    %c0_13 = arith.constant 0 : index
    %21 = memref.load %arg1[%c0_13] : memref<2xf32, #tpu.memory_space<smem>>
    %c1 = arith.constant 1 : index
    %22 = memref.load %arg1[%c1] : memref<2xf32, #tpu.memory_space<smem>>
    %23 = vector.broadcast %21 : f32 to vector<1x128xf32>
    %24 = arith.mulf %20, %23 : vector<1x128xf32>
    %25 = vector.broadcast %22 : f32 to vector<1x128xf32>
    %26 = arith.addf %24, %25 : vector<1x128xf32>
    %27 = math.exp %26 : vector<1x128xf32>
    %c0_14 = arith.constant 0 : index
    %c0_15 = arith.constant 0 : index
    %28 = vector.load %arg4[%c0_14, %c0_15] : memref<1x128xf32, #tpu.memory_space<vmem>>, vector<1x128xf32>
    %29 = arith.mulf %27, %28 : vector<1x128xf32>
    %c0_16 = arith.constant 0 : index
    %c0_17 = arith.constant 0 : index
    %30 = vector.load %arg5[%c0_16, %c0_17] : memref<1x128xf32, #tpu.memory_space<vmem>>, vector<1x128xf32>
    tpu.vector_store %arg5[%c0_16, %c0_17], %29 {strides = array<i32>} : memref<1x128xf32, #tpu.memory_space<vmem>>, vector<1x128xf32>,
    return
  }
  func.func @transform_0(%arg0: i32, %arg1: memref<2xf32, #tpu.memory_space<smem>>) -> (i32, i32) {
    %c0_i32 = arith.constant 0 : i32
    %c0_i32_0 = arith.constant 0 : i32
    return %c0_i32, %arg0 : i32, i32
  }
  func.func @transform_1(%arg0: i32, %arg1: memref<2xf32, #tpu.memory_space<smem>>) -> (i32, i32) {
    %c0_i32 = arith.constant 0 : i32
    %c0_i32_0 = arith.constant 0 : i32
    %c0_i32_1 = arith.constant 0 : i32
    return %c0_i32, %c0_i32_0 : i32, i32
  }
  func.func @transform_2(%arg0: i32, %arg1: memref<2xf32, #tpu.memory_space<smem>>) -> (i32, i32) {
    %c0_i32 = arith.constant 0 : i32
    %c0_i32_0 = arith.constant 0 : i32
    return %c0_i32, %arg0 : i32, i32
  }
  func.func @transform_3(%arg0: i32, %arg1: memref<2xf32, #tpu.memory_space<smem>>) -> (i32, i32) {
    %c0_i32 = arith.constant 0 : i32
    %c0_i32_0 = arith.constant 0 : i32
    return %c0_i32, %arg0 : i32, i32
  }
}

</mosaic_0001>

<bundles_post_ra>
// kernel: tpu_custom_call.1
= control target key start
LH: loop header
LB: loop body
LE: loop exit
PB: predicated region body
PF: predicated region fallthrough
CT: control target
= control target key end

     0   :  { %s973_s15 = smov [#allocation3]   ;;  %s1210_s0 = inlined_call_operand.hbm [shape: f32[2], index: 0, kind: input, shape index: {}]   ;;  %s1211_s1 = inlined_call_operand.hbm [shape: f32[16,256], index: 1, kind: input, shape index: {}]   ;;  %s1212_s2 = inlined_call_operand.hbm [shape: f32[80,128], index: 2, kind: input, shape index: {}]   ;;  %s1213_s3 = inlined_call_operand.vmem [shape: f32[1,256], index: 3, kind: input, shape index: {}]   ;;  %s1214_s4 = inlined_call_operand.hbm [shape: f32[1,256], index: 4, kind: output, shape index: {}]  }
   0x1   :  { %10 = dma.hbm_to_smem %s1210_s0, 16, %s973_s15, [#allocation2] }
   0x2   :  { %943 = dma.done.wait [#allocation2], 16 }
   0x3   :  { %944 = vsyncadd [#allocation2], 4294967280 }
   0x4   :  { %12 = sfence }
   0x5   :  { %13 = vsyncpa [#allocation5], 0 }
   0x6   :  { %15 = vsyncpa [#allocation5 + $0x1], 0 }
   0x7   :  { %16 = vsyncpa [#allocation8], 0 }
   0x8   :  { %17 = vsyncpa [#allocation6], 0 }
   0x9   :  { %19 = vsyncpa [#allocation6 + $0x1], 0  ;;  %s1010_s18 = smov 0   ;;  %s1012_s19 = smov 0  }
   0xa   :  { %s1014_s20 = smov 0   ;;  %s1016_s21 = smov 0  }
   0xb LB: > { %s1031_s0 = sadd.s32 4294967295, %s971_s21   ;;  %s676_s22 = sadd.s32 4294967294, %s971_s21   ;;  %s971_s21 = sphi %s1016_s21, %s1236_s21   ;;  %s967_s20 = sphi %s1014_s20, %s1235_s20   ;;  %s963_s19 = sphi %s1012_s19, %s1234_s19   ;;  %s959_s18 = sphi %s1010_s18, %s1233_s18  }
   0xc   : > { %s1035_s23 = sadd.s32 1, %s971_s21   ;;  %s32_s24 = sadd.s32 1, %s967_s20 }
   0xd   : > { %s29_s25 = ssub.s32 %s971_s21, %s1035_s23  ;;  %p39_p0 = scmp.ne.s32.totalorder %s967_s20, %s963_s19 }
   0xe   : > { %p30_p1 = scmp.eq.s32.totalorder %s29_s25, 0  ;;  %p40_p2 = scmp.eq.s32.totalorder %s971_s21, 0 }
   0xf   : > { %p45_p3 = scmp.ne.s32.totalorder %s963_s19, %s959_s18  ;;  %p1218_p4 = scmp.eq.s32.totalorder %s1031_s0, 0 }
  0x10   : > { %s1047_s26 = scalar_select %p30_p1, %s967_s20, %s32_s24  }
  0x11   : > { %p1049_p5 = por %p40_p2, %p39_p0  ;;  %p1055_p6 = por %p1218_p4, %p45_p3 }
  0x12   : > { %p116_p7 = scmp.eq.s32.totalorder %s1031_s0, 1  ;;  %p122_p8 = scmp.eq.s32.totalorder %s676_s22, 1 }
  0x13   : > { %s1220_s28 = scalar_select %p1055_p6, 1, 0 }
  0x14   : > { %p677_p9 = scmp.ge.s32.totalorder %s971_s21, 1  ;;  %p129_p10 = scmp.lt.s32.totalorder %s971_s21, 3 }
  0x15   : > { %p1062_p11 = por %p116_p7, %p39_p0  ;;  %p1066_p12 = por %p122_p8, %p45_p3 }
  0x16   : > { %p1070_p13 = pnand %p677_p9, %p129_p10  ;;  %s974_s6 = smov [#allocation7]  }
  0x17   : > { %s1221_s29 = scalar_select %p1062_p11, 1, 0 }
  0x18   : > { %s1222_s30 = scalar_select %p1066_p12, 1, 0 }
  0x19   : > { %s1223_s5 = scalar_select %p1070_p13, 1, 0 }
  0x1a   : > { %p762_p1 = pneg %p1070_p13  ;;  %s141_s7 = sshll.u32 %s974_s6, 4  ;;  %s142_s7 = int_to_ptr.vmem [resolvable:$true] %s141_s7 }
  0x1b   : > { %p775_p3 = scmp.lt.s32.totalorder %s971_s21, 2  ;;  %s155_s9 = sand.u32 1, %s967_s20  }
  0x1c   : > { %p1078_p2 = pnand %p762_p1, %p1218_p4  ;;  %s858_s10 = scalar_lea.vmem %s142_s7, 1280 }
  0x1d   : > { %p859_p8 = scmp.ne.s32.totalorder %s142_s7, %s858_s10  ;;  %p866_p12 = scmp.lt.s32.totalorder %s142_s7, %s142_s7 }
  0x1e   : > { %p849_p7 = pneg %p1078_p2  ;;  %p867_p11 = scmp.lt.s32.totalorder %s858_s10, %s858_s10 }
  0x20   : > { %p861_p9 = pnand %p859_p8, %p849_p7  ;;  %p868_p6 = por %p867_p11, %p866_p12 }
  0x22   : > { %p862_p10 = pneg %p861_p9 }
  0x24   : > { %p869_p13 = pnand %p868_p6, %p862_p10 }
  0x26   : > { %872 = shalt.err (!%p869_p13)
}
  0x27   : > { %s975_s11 = smov 128   ;;  %s976_s12 = smov 8  }
  0x28   : > { %765 = dma.hbm_to_vmem [thread:$0]  (!%p1078_p2), %s1212_s2, 1280, %s142_s7, [#allocation8], %s975_s11, %s975_s11, %s976_s12  }
  0x29   : > { %p1099_p1 = pnand %p775_p3, %p1049_p5  ;;  %s680_s16 = sshll.u32 %s155_s9, 4 }
  0x2a   : > { %s681_s17 = sshll.u32 %s971_s21, 7  ;;  %s159_s6 = scalar_lea.vmem [#allocation4], %s680_s16 }
  0x2b   : > { %s1107_s25 = scalar_lea.hbm %s1211_s1, %s681_s17  ;;  %s165_s8 = sshll.u32 %s159_s6, 4  ;;  %s1109_s8 = int_to_ptr.vmem [resolvable:$true] %s165_s8 }
  0x2c   : > { %s1111_s27 = scalar_lea.sflag [#allocation5], %s155_s9  ;;  %s873_s7 = scalar_lea.hbm %s1107_s25, 256 }
  0x2d   : > { %p874_p5 = scmp.ne.s32.totalorder %s1107_s25, %s873_s7  ;;  %p875_p6 = pneg %p1099_p1 }
  0x2e   : > { %s878_s14 = scalar_lea.hbm %s1211_s1, 512  ;;  %p879_p13 = scmp.lt.s32.totalorder %s1107_s25, %s1211_s1 }
  0x2f   : > { %p876_p11 = pnand %p875_p6, %p874_p5  ;;  %p880_p2 = scmp.lt.s32.totalorder %s878_s14, %s873_s7 }
  0x31   : > { %p877_p12 = pneg %p876_p11  ;;  %p881_p3 = por %p880_p2, %p879_p13 }
  0x33   : > { %p882_p7 = pnand %p881_p3, %p877_p12 }
  0x35   : > { %885 = shalt.err (!%p882_p7)
}
  0x36   : > { %s886_s9 = scalar_lea.vmem %s1109_s8, 256  ;;  %s977_s16 = smov [#allocation4]  }
  0x37   : > { %p887_p8 = scmp.ne.s32.totalorder %s1109_s8, %s886_s9  ;;  %s891_s24 = sshll.u32 %s977_s16, 4  ;;  %s892_s24 = int_to_ptr.vmem [resolvable:$false] %s891_s24 }
  0x38   : > { %s893_s6 = scalar_lea.vmem %s892_s24, 512  ;;  %p894_p5 = scmp.lt.s32.totalorder %s1109_s8, %s892_s24 }
  0x39   : > { %p889_p9 = pnand %p887_p8, %p875_p6  ;;  %p895_p11 = scmp.lt.s32.totalorder %s893_s6, %s886_s9 }
  0x3b   : > { %p890_p10 = pneg %p889_p9  ;;  %p896_p0 = por %p895_p11, %p894_p5 }
  0x3d   : > { %p897_p4 = pnand %p896_p0, %p890_p10 }
  0x3f   : > { %900 = shalt.err (!%p897_p4)
}
  0x40   : > { %s978_s7 = smov 256   ;;  %p1226_p6 = scmp.ne.s32.totalorder %s1223_s5, 0 }
  0x41   : > { %769 = dma.hbm_to_vmem [thread:$0]  (!%p1099_p1), %s1107_s25, 256, %s1109_s8, %s1111_s27, %s978_s7, %s975_s11, %s976_s12  }
  0x42   : > { %183 = sbr.rel (%p1226_p6) target bundleno = 771 (0x303), region = 32  ;;  %s1137_s10 = sand.u32 (!%p1226_p6), 1, %s963_s19  }
  0x43   : > { %s683_s13 = sshll.u32 (!%p1226_p6), %s1137_s10, 4  ;;  %s186_s14 = scalar_lea.sflag (!%p1226_p6), [#allocation5], %s1137_s10 }
  0x44   : > { %s189_s17 = scalar_lea.vmem (!%p1226_p6), [#allocation4], %s683_s13  ;;  %p1227_p4 = scmp.ne.s32.totalorder (!%p1226_p6), %s1220_s28, 0 }
  0x47   : > { %946 = dma.done.wait (%p1227_p4), %s186_s14, 256  }
  0x48   : > { %948 = vsyncadd (%p1227_p4), %s186_s14, 4294967040  ;;  %p1228_p0 = scmp.eq.s32.totalorder %s1031_s0, 0 }
  0x4a   : > { %950 = dma.done.wait (%p1228_p0), [#allocation8], 1280   ;;  %p1229_p1 = pmov %p1228_p0 }
  0x4b   : > { %v979_v0 = vmov 16   ;;  %vm247_vm0 = vcmask 130048   ;;  %v1149_v1 = vld [vmem:[%s189_s17 + $0x8] sm:$0xff]  ;;  %v1151_v2 = vld [vmem:[%s189_s17] sm:$0xff]  ;;  %vm369_vm1 = vcmask 261120   ;;  %v980_v10 = vmov 32  }
  0x4c   : > { %952 = vsyncadd (%p1229_p1), [#allocation8], 4294966016  ;;  %818 = vset.pattern.permute.xlu1 %v979_v0  ;;  %817 = vset.pattern.permute.xlu0 %v979_v0  ;;  %v223_v3 = vld [vmem:[#allocation7] sm:$0xff]  ;;  %v226_v4 = vld [vmem:[#allocation7 + $0x18] sm:$0xff]  ;;  %s567_s28 = sld [smem:[#allocation3]]  ;;  %p218_p12 = scmp.lt.s32.totalorder %s1031_s0, 1 }
  0x4d   : > { %719 = vmatprep.subr.mxu0 %v1149_v1  ;;  %723 = vmatprep.mubr.msk.f32.mxu0 %vm247_vm0, %v223_v3  ;;  %v224_v5 = vld [vmem:[#allocation7 + $0x8] sm:$0xff]  ;;  %v225_v6 = vld [vmem:[#allocation7 + $0x10] sm:$0xff]  ;;  %v345_v7 = vld [vmem:[#allocation7 + $0x20] sm:$0xff]  ;;  %s695_s5 = sld [smem:[#allocation3 + $0x1]]  ;;  %s696_s8 = sshll.u32 %s1031_s0, 4 }
  0x4e   : > { %720 = vmatpush3.msra.mxu0 %v1149_v1  ;;  %244 = vperm.xlu0 %817, %v226_v4   ;;  %v347_v8 = vld [vmem:[#allocation7 + $0x30] sm:$0xff]  ;;  %v348_v9 = vld [vmem:[#allocation7 + $0x38] sm:$0xff]  ;;  %v467_v11 = vld [vmem:[#allocation7 + $0x40] sm:$0xff]  ;;  %s219_s11 = scalar_select %p218_p12, %s1031_s0, 1 }
  0x4f   : > { %721 = vmatprep.subr.mxu0 %v1151_v2  ;;  %234 = vperm.xlu1 %818, %v224_v5   ;;  %v346_v12 = vld [vmem:[#allocation7 + $0x28] sm:$0xff]  ;;  %s217_s27 = scalar_lea.vmem [#allocation9], %s1137_s10  ;;  %s589_s24 = scalar_lea.hbm %s1214_s4, %s696_s8 }
  0x50   : > { %722 = vmatpush3.msra.mxu0 %v1151_v2  ;;  %737 = vmatprep.mubr.msk.f32.mxu1 %vm369_vm1, %v345_v7  ;;  %v468_v13 = vld [vmem:[#allocation7 + $0x48] sm:$0xff]  ;;  %s220_s25 = scalar_lea.vmem %s1213_s3, %s219_s11  ;;  %s591_s22 = sshll.u32 %s217_s27, 4  ;;  %s592_s22 = int_to_ptr.vmem [resolvable:$true] %s591_s22 }
  0x51   : > { %724 = vmatmul.mubr.msk.f32.vlgmr.msra.gmra.mxu0 %vm247_vm0, %v224_v5  ;;  %s579_s6 = scalar_lea.sflag [#allocation6], %s1137_s10  ;;  %s901_s7 = scalar_lea.vmem %s592_s22, 16 }
  0x52   : > { %726 = vmatprep.mubr.msk.f32.mxu0 %vm247_vm0, %v225_v6  ;;  %239 = vperm.xlu0 %817, %v225_v6   ;;  %v569_v60 = vstv %s567_s28  ;;  %p902_p13 = scmp.ne.s32.totalorder %s592_s22, %s901_s7  ;;  %p1230_p2 = scmp.ne.s32.totalorder %s1221_s29, 0 }
  0x53   : > { %229 = vperm.xlu1 %818, %v223_v3   ;;  %v571_v62 = vstv %s695_s5  ;;  %s981_s13 = smov [#allocation9]  }
  0x54   : > { %p903_p3 = pnand %p902_p13, %p1230_p2  ;;  %s905_s14 = sshll.u32 %s981_s13, 4  ;;  %s906_s14 = int_to_ptr.vmem [resolvable:$false] %s905_s14 }
  0x55   : > { %727 = vmatmul.mubr.msk.f32.gmra.mxu0 %vm247_vm0, %v226_v4  ;;  %s907_s0 = scalar_lea.vmem %s906_s14, 32  ;;  %p908_p8 = scmp.lt.s32.totalorder %s592_s22, %s906_s14 }
  0x56   : > { %819 = vset.pattern.permute.xlu0 %v980_v10  ;;  %751 = vmatprep.mubr.msk.f32.mxu0 %vm369_vm1, %v467_v11  ;;  %p904_p7 = pneg %p903_p3  ;;  %p909_p9 = scmp.lt.s32.totalorder %s907_s0, %s901_s7 }
  0x57   : > { %820 = vset.pattern.permute.xlu1 %v980_v10  ;;  %366 = vperm.xlu0 %819, %v348_v9  }
  0x58   : > { %361 = vperm.xlu1 %820, %v347_v8   ;;  %p910_p10 = por %p909_p9, %p908_p8 }
  0x5a   : > { %p911_p5 = pnand %p910_p10, %p904_p7 }
  0x5b   : > { %351 = vperm.xlu0 %819, %v345_v7  }
  0x5c   : > { %356 = vperm.xlu1 %820, %v346_v12  }
  0x5f   : > { %476 = vperm.xlu0 %819, %v468_v13  }
  0x60   : > { %471 = vperm.xlu1 %820, %v467_v11  }
  0xc9   : > { %v245_v14 = vpop.permute.xlu0 %244 }
  0xca   : > { %v235_v15 = vpop.permute.xlu1 %234 }
  0xcd   : > { %v240_v19 = vpop.permute.xlu0 %239 }
  0xce   : > { %v230_v21 = vpop.permute.xlu1 %229 }
  0xd2   : > { %v367_v32 = vpop.permute.xlu0 %366 }
  0xd3   : > { %v362_v30 = vpop.permute.xlu1 %361 }
  0xd6   : > { %v352_v40 = vpop.permute.xlu0 %351 }
  0xd7   : > { %v357_v34 = vpop.permute.xlu1 %356 }
  0xda   : > { %v477_v46 = vpop.permute.xlu0 %476 }
  0xdb   : > { %v472_v49 = vpop.permute.xlu1 %471 }
 0x111   : > { %v725_v16 = vpop.f32.mrf.mxu0 }
 0x112   : > { %v328_v23 = vadd.f32 %v725_v16, %v235_v15 }
 0x113   : > { %v322_v17 = vpop.f32.mrf.mxu0 }
 0x114   : > { %v323_v25 = vadd.f32 %v322_v17, %v230_v21 }
 0x115   : > { %v728_v18 = vpop.f32.mrf.mxu0 }
 0x116   : > { %v338_v20 = vadd.f32 %v728_v18, %v245_v14 }
 0x117   : > { %v332_v22 = vpop.f32.mrf.mxu0 }
 0x118   : > { %821 = vtanh.f32 %v338_v20  ;;  %v333_v24 = vadd.f32 %v332_v22, %v240_v19 }
 0x11a   : > { %823 = vtanh.f32 %v333_v24 }
 0x11b   : > { %825 = vtanh.f32 %v328_v23 }
 0x11c   : > { %827 = vtanh.f32 %v323_v25 }
 0x125   : > { %v822_v26 = vpop.eup %821 }
 0x126   : > { %729 = vmatprep.subr.mxu1 %v822_v26 }
 0x127   : > { %v824_v27 = vpop.eup %823  ;;  %730 = vmatpush3.msra.mxu1 %v822_v26 }
 0x128   : > { %731 = vmatprep.subr.mxu1 %v824_v27  ;;  %v826_v28 = vpop.eup %825 }
 0x129   : > { %732 = vmatpush3.msra.mxu1 %v824_v27  ;;  %v828_v29 = vpop.eup %827 }
 0x12a   : > { %733 = vmatprep.subr.mxu1 %v826_v28 }
 0x12b   : > { %734 = vmatpush3.msra.mxu1 %v826_v28 }
 0x12c   : > { %735 = vmatprep.subr.mxu1 %v828_v29 }
 0x12d   : > { %736 = vmatpush3.msra.mxu1 %v828_v29 }
 0x12e   : > { %738 = vmatmul.mubr.msk.f32.vlgmr.msra.gmra.mxu1 %vm369_vm1, %v346_v12 }
 0x12f   : > { %740 = vmatprep.mubr.msk.f32.mxu1 %vm369_vm1, %v347_v8 }
 0x132   : > { %741 = vmatmul.mubr.msk.f32.gmra.mxu1 %vm369_vm1, %v348_v9 }
 0x1ee   : > { %v739_v31 = vpop.f32.mrf.mxu1 }
 0x1ef   : > { %v450_v38 = vadd.f32 %v739_v31, %v357_v34 }
 0x1f0   : > { %v444_v33 = vpop.f32.mrf.mxu1 }
 0x1f1   : > { %v445_v41 = vadd.f32 %v444_v33, %v352_v40 }
 0x1f2   : > { %v742_v35 = vpop.f32.mrf.mxu1 }
 0x1f3   : > { %v460_v36 = vadd.f32 %v742_v35, %v367_v32 }
 0x1f4   : > { %v454_v37 = vpop.f32.mrf.mxu1 }
 0x1f5   : > { %829 = vtanh.f32 %v460_v36  ;;  %v455_v39 = vadd.f32 %v454_v37, %v362_v30 }
 0x1f7   : > { %831 = vtanh.f32 %v455_v39 }
 0x1f8   : > { %833 = vtanh.f32 %v450_v38 }
 0x1f9   : > { %835 = vtanh.f32 %v445_v41 }
 0x202   : > { %v830_v42 = vpop.eup %829 }
 0x203   : > { %743 = vmatprep.subr.mxu0 %v830_v42 }
 0x204   : > { %v832_v43 = vpop.eup %831  ;;  %744 = vmatpush3.msra.mxu0 %v830_v42 }
 0x205   : > { %745 = vmatprep.subr.mxu0 %v832_v43  ;;  %v834_v44 = vpop.eup %833 }
 0x206   : > { %746 = vmatpush3.msra.mxu0 %v832_v43  ;;  %v836_v45 = vpop.eup %835 }
 0x207   : > { %747 = vmatprep.subr.mxu0 %v834_v44 }
 0x208   : > { %748 = vmatpush3.msra.mxu0 %v834_v44 }
 0x209   : > { %749 = vmatprep.subr.mxu0 %v836_v45 }
 0x20a   : > { %750 = vmatpush3.msra.mxu0 %v836_v45 }
 0x20b   : > { %752 = vmatmul.mubr.msk.f32.vlgmr.msra.gmra.mxu0 %vm369_vm1, %v468_v13 }
 0x2cb   : > { %v753_v47 = vpop.f32.mrf.mxu0 }
 0x2cc   : > { %v555_v48 = vadd.f32 %v753_v47, %v477_v46 }
 0x2cd   : > { %v549_v50 = vpop.f32.mrf.mxu0 }
 0x2ce   : > { %v550_v51 = vadd.f32 %v549_v50, %v472_v49  ;;  %v559_v52 = vmul.f32 %v555_v48, %v1149_v1 }
 0x2d0   : > { %v558_v53 = vmul.f32 %v550_v51, %v1151_v2  ;;  %v575_v2 = vld [vmem:[%s220_s25] sm:$0x1] }
 0x2d2   : > { %v560_v54 = vadd.f32 %v559_v52, %v558_v53 }
 0x2d4   : > { %v561_v55 = vrot.slane %v560_v54, 4 }
 0x2d6   : > { %v562_v56 = vadd.f32 %v561_v55, %v560_v54 }
 0x2d8   : > { %v563_v57 = vrot.slane %v562_v56, 2 }
 0x2da   : > { %v564_v58 = vadd.f32 %v563_v57, %v562_v56 }
 0x2dc   : > { %v565_v59 = vrot.slane %v564_v58, 1 }
 0x2de   : > { %v566_v61 = vadd.f32 %v565_v59, %v564_v58 }
 0x2e0   : > { %v570_v63 = vmul.f32 %v569_v60, %v566_v61 }
 0x2e2   : > { %v572_v0 = vadd.f32 %v571_v62, %v570_v63 }
 0x2e4   : > { %v573_v1 = vmul.f32 1.442695, %v572_v0 }
 0x2e6   : > { %837 = vpow2.f32 %v573_v1 }
 0x2f3   : > { %v838_v3 = vpop.eup %837 }
 0x2f4   : > { %v576_v4 = vmul.f32 %v838_v3, %v575_v2 }
 0x2f6   : > { %577 = vst [vmem:[%s217_s27] sm:$0x1] %v576_v4 }
 0x2f7   : > { %914 = shalt.err (!%p911_p5)
}
 0x2f8   : > { %s915_s17 = scalar_lea.hbm %s589_s24, 16  ;;  %s919_s5 = scalar_lea.hbm %s1214_s4, 32 }
 0x2f9   : > { %p916_p11 = scmp.ne.s32.totalorder %s589_s24, %s915_s17  ;;  %p920_p0 = scmp.lt.s32.totalorder %s589_s24, %s1214_s4 }
 0x2fa   : > { %p921_p1 = scmp.lt.s32.totalorder %s919_s5, %s915_s17 }
 0x2fb   : > { %p917_p6 = pnand %p916_p11, %p1230_p2 }
 0x2fc   : > { %p922_p12 = por %p921_p1, %p920_p0 }
 0x2fd   : > { %p918_p4 = pneg %p917_p6 }
 0x2ff   : > { %p923_p13 = pnand %p922_p12, %p918_p4 }
 0x301   : > { %926 = shalt.err (!%p923_p13)
}
 0x302   : > { %760 = dma.vmem_to_hbm [thread:$0]  (%p1230_p2), %s592_s22, 16, %s589_s24, %s579_s6  }
 0x303 PF: > { %s603_s15 = sand.u32 1, %s959_s18   ;;  %p1231_p3 = scmp.ne.s32.totalorder %s1222_s30, 0 }
 0x304   : > { %p1232_p7 = scmp.ge.s32.totalorder %s971_s21, 2  ;;  %s604_s25 = scalar_lea.sflag [#allocation6], %s603_s15 }
 0x306   : > { %p771_p8 = pnand %p1232_p7, %p1231_p3 }
 0x308   : > { %p772_p9 = pneg %p771_p8 }
 0x30a   : > { %954 = dma.done.wait (%p772_p9), %s604_s25, 16  }
 0x30b   : > { %956 = vsyncadd (%p772_p9), %s604_s25, 4294967280  ;;  %p22_p10 = scmp.ge.s32.totalorder %s1035_s23, 4   ;;  %s1233_s18 = smov %s963_s19 }
 0x30c   : > { %s1234_s19 = smov %s967_s20  ;;  %s1235_s20 = smov %s1047_s26 }
 0x30d   : > { %s1236_s21 = smov %s1035_s23  ;;  %24 = sbr.rel (!%p22_p10) target bundleno = 11 (0xb), region = 84 }
 0x312   :  { %608 = vsyncpa [#allocation5], 1 }
 0x313   :  { %610 = vsyncpa [#allocation5 + $0x1], 1 }
 0x314   :  { %611 = vsyncpa [#allocation8], 1 }
 0x315   :  { %612 = vsyncpa [#allocation6], 1 }
 0x316   :  { %614 = vsyncpa [#allocation6 + $0x1], 1 }

</bundles_post_ra>
